<compile_context>
chip_gen: v7x
topology: tpu7x:2x2x1
jax: 0.10.0
libtpu: 0.0.40
codegen_flags: <defaults>
</compile_context>

<pallas_src>
import functools

import jax
import jax.numpy as jnp
from jax.experimental import pallas as pl
from jax.experimental.pallas import tpu as pltpu


def _round_up(x, m):
    return ((x + m - 1) // m) * m


def _mlp_decoder_kernel(x_ref, w_ref, b_ref, *out_refs, cast_x_to):
    # x_ref: (tm, H) row tile (H = unpadded hidden; last tile may be partial)
    # w_ref: (H, V_pad) resident weight (constant index_map)
    # b_ref: (1, V_pad) bias; padded vocab lanes hold -1e30 (softmax mask).
    x = x_ref[...]
    if cast_x_to is not None:
        x = x.astype(cast_x_to)

    # Linear readout on the MXU, f32 accumulation.
    logits = jnp.dot(x, w_ref[...], preferred_element_type=jnp.float32)
    logits = logits + b_ref[...].astype(jnp.float32)

    # Numerically stable log_softmax along the (padded) vocab dim.  Padded
    # lanes carry -1e30, so they never win the max and exp() underflows to 0.
    m = jnp.max(logits, axis=-1, keepdims=True)
    shifted = logits - m
    lse = jnp.log(jnp.sum(jnp.exp(shifted), axis=-1, keepdims=True))
    log_probs = shifted - lse

    logp_ref = out_refs[0]
    logp_ref[...] = log_probs.astype(logp_ref.dtype)
    if len(out_refs) > 1:
        logits_ref = out_refs[1]
        logits_ref[...] = logits.astype(logits_ref.dtype)


@functools.partial(
    jax.jit, static_argnames=("block_rows", "use_bf16_matmul", "return_logits"))
def mlp_decoder(h_V, weight, bias, *, block_rows=1024,
                use_bf16_matmul=None, return_logits=True):
    """Pallas implementation of MLPDecoder.forward.

    h_V:    (..., hidden_dim)
    weight: (hidden_dim, vocab)   (transposed vs. torch nn.Linear storage)
    bias:   (vocab,)
    returns (log_probs, logits) if return_logits else log_probs,
            shaped (..., vocab)
    """
    *lead, hidden = h_V.shape
    h_w, vocab = weight.shape
    assert h_w == hidden, "weight must be (hidden_dim, vocab)"
    out_dtype = h_V.dtype

    x = h_V.reshape(-1, hidden)        # no row / hidden padding in HBM
    n_rows = x.shape[0]

    # bf16 matmul only pays off when the matmul is non-negligible; for tiny
    # hidden the per-tile cast is pure VPU overhead (and v5e's VPU lacks bf16).
    if use_bf16_matmul is None:
        use_bf16_matmul = hidden >= 1024

    v_pad = _round_up(vocab, 128)      # lane-dense, unmasked output stores
    n_out = 2 if return_logits else 1

    # ---- Pad only the tiny parameters (one-time) ---------------------------
    w = weight
    if v_pad != vocab:
        w = jnp.pad(w, ((0, 0), (0, v_pad - vocab)))
    if use_bf16_matmul and w.dtype == jnp.float32:
        w = w.astype(jnp.bfloat16)     # hoisted: cast once, not per grid step
    b2d = bias.reshape(1, vocab).astype(jnp.float32)
    if v_pad != vocab:
        # Poisoned padded lanes double as the log_softmax mask.
        b2d = jnp.pad(b2d, ((0, 0), (0, v_pad - vocab)), constant_values=-1e30)

    # ---- Row tile & VMEM budget (generation-aware) -------------------------
    try:
        vmem_cap = int(pltpu.get_tpu_info().vmem_capacity_bytes)
    except Exception:                  # pragma: no cover - conservative default
        vmem_cap = 64 * 1024 * 1024    # v7x physical VMEM per TC
    headroom = 8 << 20
    budget = max(16 << 20, vmem_cap - headroom)

    out_itemsize = jnp.dtype(out_dtype).itemsize
    per_row = (2 * hidden * x.dtype.itemsize          # double-buffered x tile
               + 2 * n_out * v_pad * out_itemsize)    # double-buffered outputs
    static_b = 2 * hidden * v_pad * w.dtype.itemsize + 2 * 8 * v_pad * 4

    block_rows = max(8, min(int(block_rows), _round_up(n_rows, 8)))
    block_rows = _round_up(block_rows, 8)
    max_rows = max(8, ((budget - headroom - static_b) // per_row) // 8 * 8)
    block_rows = min(block_rows, max_rows)

    grid = (pl.cdiv(n_rows, block_rows),)   # partial last tile masked by Pallas
    vmem_needed = static_b + per_row * block_rows
    vmem_limit = int(min(max(vmem_needed + headroom, 32 << 20), budget))

    # Advisory cost hint (padded vocab, actual dtypes).
    cost = pl.CostEstimate(
        flops=2 * n_rows * hidden * v_pad,
        transcendentals=n_rows * v_pad,
        bytes_accessed=(n_rows * hidden * x.dtype.itemsize
                        + hidden * v_pad * w.dtype.itemsize
                        + v_pad * 4
                        + n_out * n_rows * v_pad * out_itemsize),
    )

    kernel = functools.partial(
        _mlp_decoder_kernel,
        cast_x_to=jnp.bfloat16 if use_bf16_matmul else None)

    out_shapes = [jax.ShapeDtypeStruct((n_rows, v_pad), out_dtype)]
    out_specs = [pl.BlockSpec((block_rows, v_pad), lambda i: (i, 0))]
    if return_logits:
        out_shapes.append(jax.ShapeDtypeStruct((n_rows, v_pad), out_dtype))
        out_specs.append(pl.BlockSpec((block_rows, v_pad), lambda i: (i, 0)))

    outs = pl.pallas_call(
        kernel,
        out_shape=tuple(out_shapes),
        grid_spec=pltpu.PrefetchScalarGridSpec(
            num_scalar_prefetch=0,
            grid=grid,
            in_specs=[
                # Block last dim == full hidden dim (legal); no HBM padding.
                pl.BlockSpec((block_rows, hidden), lambda i: (i, 0)),
                pl.BlockSpec((hidden, v_pad), lambda i: (0, 0)),
                pl.BlockSpec((1, v_pad), lambda i: (0, 0)),
            ],
            out_specs=out_specs,
        ),
        compiler_params=pltpu.CompilerParams(
            dimension_semantics=("parallel",),
            vmem_limit_bytes=vmem_limit,
        ),
        cost_estimate=cost,
    )(x, w, b2d)

    out_shape = tuple(lead) + (vocab,)
    log_probs_p = outs[0][:, :vocab].reshape(out_shape)
    if not return_logits:
        return log_probs_p
    logits_p = outs[1][:, :vocab].reshape(out_shape)
    return log_probs_p, logits_p


def _reference(h_V, weight, bias):
    logits = jnp.einsum("...h,hv->...v", h_V, weight) + bias
    log_probs = jax.nn.log_softmax(logits, axis=-1)
    return log_probs, logits


if __name__ == "__main__":
    # Small shapes consistent with the module: (batch=2, seq=8, hidden=32), vocab=20.
    batch, seq, hidden, vocab = 2, 8, 32, 20

    key = jax.random.PRNGKey(0)
    k_x, k_w, k_b = jax.random.split(key, 3)

    h_V = jax.random.normal(k_x, (batch, seq, hidden), dtype=jnp.float32)
    # Deterministic parameter init (mimics nn.Linear uniform(-1/sqrt(H), 1/sqrt(H))).
    bound = 1.0 / jnp.sqrt(jnp.float32(hidden))
    weight = jax.random.uniform(k_w, (hidden, vocab), jnp.float32, -bound, bound)
    bias = jax.random.uniform(k_b, (vocab,), jnp.float32, -bound, bound)

    log_probs, logits = mlp_decoder(h_V, weight, bias)
    jax.block_until_ready((log_probs, logits))

    ref_lp, ref_lg = _reference(h_V, weight, bias)
    assert logits.shape == (batch, seq, vocab) and log_probs.shape == (batch, seq, vocab)
    assert jnp.allclose(logits, ref_lg, atol=1e-5, rtol=1e-5)
    assert jnp.allclose(log_probs, ref_lp, atol=1e-5, rtol=1e-5)

    # Write-traffic-halved path (log_probs only).
    lp_only = mlp_decoder(h_V, weight, bias, return_logits=False)
    jax.block_until_ready(lp_only)
    assert jnp.allclose(lp_only, ref_lp, atol=1e-5, rtol=1e-5)

    print("KERNEL_OK")
</pallas_src>

<mosaic_0001>
module attributes {stable_mosaic.version = 11 : i64} {
  func.func @_mlp_decoder_kernel(%arg0: i32, %arg1: memref<16x32xf32, #tpu.memory_space<vmem>>, %arg2: memref<32x128xf32, #tpu.memory_space<vmem>>, %arg3: memref<1x128xf32, #tpu.memory_space<vmem>>, %arg4: memref<16x128xf32, #tpu.memory_space<vmem>>, %arg5: memref<16x128xf32, #tpu.memory_space<vmem>>) attributes {dimension_semantics = [#tpu.dimension_semantics<parallel>], iteration_bounds = array<i64: 1>, scalar_prefetch = 0 : i64, scratch_operands = 0 : i64, tpu.core_type = #tpu.core_type<tc>, window_params = [{transform_indices = @transform_0, window_bounds = array<i64: 16, 32>}, {pipeline_mode = #tpu.pipeline_mode<synchronous>, transform_indices = @transform_1, window_bounds = array<i64: 32, 128>}, {pipeline_mode = #tpu.pipeline_mode<synchronous>, transform_indices = @transform_2, window_bounds = array<i64: 1, 128>}, {transform_indices = @transform_3, window_bounds = array<i64: 16, 128>}, {transform_indices = @transform_4, window_bounds = array<i64: 16, 128>}]} {
    %c0 = arith.constant 0 : index
    %c0_0 = arith.constant 0 : index
    %0 = vector.load %arg1[%c0, %c0_0] : memref<16x32xf32, #tpu.memory_space<vmem>>, vector<16x32xf32>
    %c0_1 = arith.constant 0 : index
    %c0_2 = arith.constant 0 : index
    %1 = vector.load %arg2[%c0_1, %c0_2] : memref<32x128xf32, #tpu.memory_space<vmem>>, vector<32x128xf32>
    %cst = arith.constant dense<0.000000e+00> : vector<16x128xf32>
    %2 = tpu.matmul %0, %1, %cst {dimension_numbers = #tpu.dot_dimension_numbers<[1], [0], [0], [1], [0, 0, 1, 1], [], []>} : vector<16x32xf32>, vector<32x128xf32>, vector<16x128xf32> -> vector<16x128xf32>
    %c0_3 = arith.constant 0 : index
    %c0_4 = arith.constant 0 : index
    %3 = vector.load %arg3[%c0_3, %c0_4] : memref<1x128xf32, #tpu.memory_space<vmem>>, vector<1x128xf32>
    %4 = vector.broadcast %3 : vector<1x128xf32> to vector<16x128xf32>
    %5 = arith.addf %2, %4 : vector<16x128xf32>
    %cst_5 = arith.constant dense<0xFF800000> : vector<16xf32>
    %6 = vector.multi_reduction <maximumf>, %5, %cst_5 [1] : vector<16x128xf32> to vector<16xf32>
    %7 = vector.shape_cast %6 : vector<16xf32> to vector<16x1xf32>
    %8 = vector.broadcast %7 : vector<16x1xf32> to vector<16x128xf32>
    %9 = arith.subf %5, %8 : vector<16x128xf32>
    %10 = math.exp %9 : vector<16x128xf32>
    %cst_6 = arith.constant dense<0.000000e+00> : vector<16xf32>
    %11 = vector.multi_reduction <add>, %10, %cst_6 [1] : vector<16x128xf32> to vector<16xf32>
    %12 = vector.shape_cast %11 : vector<16xf32> to vector<16x1xf32>
    %13 = math.log %12 : vector<16x1xf32>
    %14 = vector.broadcast %13 : vector<16x1xf32> to vector<16x128xf32>
    %15 = arith.subf %9, %14 : vector<16x128xf32>
    %c0_7 = arith.constant 0 : index
    %c0_8 = arith.constant 0 : index
    %16 = vector.load %arg4[%c0_7, %c0_8] : memref<16x128xf32, #tpu.memory_space<vmem>>, vector<16x128xf32>
    tpu.vector_store %arg4[%c0_7, %c0_8], %15 {strides = array<i32>} : memref<16x128xf32, #tpu.memory_space<vmem>>, vector<16x128xf32>,
    %c0_9 = arith.constant 0 : index
    %c0_10 = arith.constant 0 : index
    %17 = vector.load %arg5[%c0_9, %c0_10] : memref<16x128xf32, #tpu.memory_space<vmem>>, vector<16x128xf32>
    tpu.vector_store %arg5[%c0_9, %c0_10], %5 {strides = array<i32>} : memref<16x128xf32, #tpu.memory_space<vmem>>, vector<16x128xf32>,
    return
  }
  func.func @transform_0(%arg0: i32) -> (i32, i32) {
    %c0_i32 = arith.constant 0 : i32
    %c0_i32_0 = arith.constant 0 : i32
    return %arg0, %c0_i32 : i32, i32
  }
  func.func @transform_1(%arg0: i32) -> (i32, i32) {
    %c0_i32 = arith.constant 0 : i32
    %c0_i32_0 = arith.constant 0 : i32
    %c0_i32_1 = arith.constant 0 : i32
    return %c0_i32, %c0_i32_0 : i32, i32
  }
  func.func @transform_2(%arg0: i32) -> (i32, i32) {
    %c0_i32 = arith.constant 0 : i32
    %c0_i32_0 = arith.constant 0 : i32
    %c0_i32_1 = arith.constant 0 : i32
    return %c0_i32, %c0_i32_0 : i32, i32
  }
  func.func @transform_3(%arg0: i32) -> (i32, i32) {
    %c0_i32 = arith.constant 0 : i32
    %c0_i32_0 = arith.constant 0 : i32
    return %arg0, %c0_i32 : i32, i32
  }
  func.func @transform_4(%arg0: i32) -> (i32, i32) {
    %c0_i32 = arith.constant 0 : i32
    %c0_i32_0 = arith.constant 0 : i32
    return %arg0, %c0_i32 : i32, i32
  }
}

</mosaic_0001>

<bundles_post_ra>
// kernel: mlp_decoder.1
= control target key start
LH: loop header
LB: loop body
LE: loop exit
PB: predicated region body
PF: predicated region fallthrough
CT: control target
= control target key end

     0   :  { %vm29_vm0 = vcmask 261120   ;;  %s237_s1 = inlined_call_operand.vmem [shape: f32[32,128], index: 1, kind: input, shape index: {}]   ;;  %s238_s0 = inlined_call_operand.vmem [shape: f32[16,32], index: 0, kind: input, shape index: {}]   ;;  %s239_s2 = inlined_call_operand.vmem [shape: f32[1,128], index: 2, kind: input, shape index: {}]   ;;  %s240_s4 = inlined_call_operand.vmem [shape: f32[16,128], index: 4, kind: output, shape index: {1}]   ;;  %s241_s3 = inlined_call_operand.vmem [shape: f32[16,128], index: 3, kind: output, shape index: {0}]  }
   0x1   :  { %v18_v0 = vld [vmem:[%s237_s1] sm:$0xff]  ;;  %v19_v1 = vld [vmem:[%s237_s1 + $0x8] sm:$0xff]  ;;  %v20_v2 = vld [vmem:[%s237_s1 + $0x10] sm:$0xff] }
   0x2   :  { %v163_v3 = vpack.c.bf16 %v19_v1, %v18_v0  ;;  %v21_v4 = vld [vmem:[%s237_s1 + $0x18] sm:$0xff]  ;;  %v16_v5 = vld [vmem:[%s238_s0] sm:$0xff]  ;;  %v17_v7 = vld [vmem:[%s238_s0 + $0x8] sm:$0xff] }
   0x3   :  { %v167_v6 = vpack.c.bf16 %v21_v4, %v20_v2  ;;  %160 = vmatprep.mubr.msk.f32.mxu0 %vm29_vm0, %v16_v5  ;;  %v143_v8 = vld [vmem:[%s239_s2] ss:$0 sm:$0xff] }
   0x4   :  { %164 = vmatprep.subr.bf16.mxu0 %v163_v3 }
   0x5   :  { %166 = vmatpush3.bf16.msra.mxu0 %v163_v3 }
   0x6   :  { %168 = vmatprep.subr.bf16.mxu0 %v167_v6 }
   0x9   :  { %170 = vmatpush3.bf16.msra.mxu0 %v167_v6 }
   0xc   :  { %161 = vmatmul.mubr.msk.f32.vlgmr.msra.gmra.mrb[0].mxu0 %vm29_vm0, %v17_v7 }
  0xdf   :  { %v162_v9 = vpop.f32.mrb[0].mxu0 }
  0xe0   :  { %v108_v10 = vadd.f32 %v162_v9, %v143_v8  ;;  %v102_v11 = vpop.f32.mrb[1].mxu0 }
  0xe1   :  { %v103_v12 = vadd.f32 %v143_v8, %v102_v11 }
  0xe2   :  { %134 = vst [vmem:[%s240_s4 + $0x8] sm:$0xff] %v108_v10 }
  0xe3   :  { %133 = vst [vmem:[%s240_s4] sm:$0xff] %v103_v12  ;;  %111 = vmax.xlane.f32.xlu0 %v103_v12 }
  0xe7   :  { %113 = vmax.xlane.f32.xlu0 %v108_v10 }
 0x170   :  { %v112_v13 = vpop.xlane.xlu0 %111 }
 0x171   :  { %v115_v14 = vsub.f32 %v103_v12, %v112_v13 }
 0x173   :  { %v117_v15 = vmul.f32 1.442695, %v115_v14 }
 0x174   :  { %v114_v16 = vpop.xlane.xlu0 %113 }
 0x175   :  { %v116_v17 = vsub.f32 %v108_v10, %v114_v16  ;;  %171 = vpow2.f32 %v117_v15 }
 0x177   :  { %v119_v18 = vmul.f32 1.442695, %v116_v17 }
 0x179   :  { %173 = vpow2.f32 %v119_v18 }
 0x17f   :  { %v172_v19 = vpop.eup %171 }
 0x180   :  { %121 = vadd.xlane.f32.xlu1 %v172_v19 }
 0x183   :  { %v174_v20 = vpop.eup %173 }
 0x184   :  { %123 = vadd.xlane.f32.xlu1 %v174_v20 }
 0x20d   :  { %v122_v21 = vpop.xlane.xlu1 %121 }
 0x20e   :  { %175 = vlog2.f32 %v122_v21 }
 0x211   :  { %v124_v22 = vpop.xlane.xlu1 %123 }
 0x212   :  { %177 = vlog2.f32 %v124_v22 }
 0x218   :  { %v176_v23 = vpop.eup %175 }
 0x219   :  { %v126_v24 = vmul.f32 0.6931472, %v176_v23 }
 0x21b   :  { %v129_v25 = vsub.f32 %v115_v14, %v126_v24 }
 0x21c   :  { %v178_v26 = vpop.eup %177 }
 0x21d   :  { %131 = vst [vmem:[%s241_s3] sm:$0xff] %v129_v25  ;;  %v128_v27 = vmul.f32 0.6931472, %v178_v26 }
 0x21f   :  { %v130_v28 = vsub.f32 %v116_v17, %v128_v27 }
 0x221   :  { %132 = vst [vmem:[%s241_s3 + $0x8] sm:$0xff] %v130_v28 }

</bundles_post_ra>
